<compile_context>
chip_gen: v7x
topology: tpu7x:2x2x1
jax: 0.10.0
libtpu: 0.0.40
codegen_flags: <defaults>
</compile_context>

<pallas_src>
import functools

import numpy as np
import jax
import jax.numpy as jnp
from jax import lax
from jax.experimental import pallas as pl
from jax.experimental.pallas import tpu as pltpu


# ----------------------------------------------------------------------------
# Deterministic quaternion weight init (numpy replica of quaternion_init with
# init_criterion='glorot'; chi(4) modulus + random unit imaginary axis).
# ----------------------------------------------------------------------------
def quaternion_init(rng, w_shape, kernel_size):
    out_ch, in_ch = w_shape[0], w_shape[1]
    receptive_field = int(np.prod(kernel_size))
    fan_in = in_ch * receptive_field
    fan_out = out_ch * receptive_field
    s = 1.0 / np.sqrt(2.0 * (fan_in + fan_out))  # 'glorot'

    modulus = s * np.sqrt(np.sum(rng.normal(size=w_shape + (4,)) ** 2, axis=-1))

    n = int(np.prod(w_shape))
    v_i = rng.uniform(-1.0, 1.0, n)
    v_j = rng.uniform(-1.0, 1.0, n)
    v_k = rng.uniform(-1.0, 1.0, n)
    norm = np.sqrt(v_i ** 2 + v_j ** 2 + v_k ** 2) + 1e-4
    v_i = (v_i / norm).reshape(w_shape)
    v_j = (v_j / norm).reshape(w_shape)
    v_k = (v_k / norm).reshape(w_shape)

    phase = rng.uniform(-np.pi, np.pi, w_shape)
    w_r = modulus * np.cos(phase)
    w_i = modulus * v_i * np.sin(phase)
    w_j = modulus * v_j * np.sin(phase)
    w_k = modulus * v_k * np.sin(phase)
    return (w_r.astype(np.float32), w_i.astype(np.float32),
            w_j.astype(np.float32), w_k.astype(np.float32))


# ----------------------------------------------------------------------------
# Hamilton-product block weight (same torch.cat layout as quaternion_conv).
# ----------------------------------------------------------------------------
def make_quaternion_kernel(r, i, j, k):
    cat_r = jnp.concatenate([r, -i, -j, -k], axis=1)
    cat_i = jnp.concatenate([i,  r, -k,  j], axis=1)
    cat_j = jnp.concatenate([j,  k,  r, -i], axis=1)
    cat_k = jnp.concatenate([k, -j,  i,  r], axis=1)
    # (C_out, C_in, K)
    return jnp.concatenate([cat_r, cat_i, cat_j, cat_k], axis=0)


# ----------------------------------------------------------------------------
# Pallas kernel.  Grid = (N // lt,) over batch tiles ("parallel").
#   w_ref  : (C_out, K*C_in)      -- resident (constant index_map), bf16
#   x_ref  : (lt, C_in, L_pad)    -- padded input rows for this batch tile, f32
#   o_ref  : (C_out, lt*L_out)    -- lane-flattened output block, f32
#   rhs_ref: (K*C_in, lt*L_out)   -- VMEM staging for the im2col columns, f32
# ----------------------------------------------------------------------------
def qconv1d_kernel(w_ref, x_ref, o_ref, rhs_ref, *,
                   K, C_in, L_out, stride, dilatation, lt, compute_dtype):
    # Stage the im2col columns for this batch tile directly in VMEM
    # (the K-times blowup never touches HBM).  All loops are static/unrolled.
    for b in range(lt):
        for k in range(K):
            start = k * dilatation
            if stride == 1:
                tap = x_ref[b, :, start:start + L_out]          # (C_in, L_out)
            else:
                tap = x_ref[b, :, pl.ds(start, L_out, stride=stride)]
            rhs_ref[k * C_in:(k + 1) * C_in,
                    b * L_out:(b + 1) * L_out] = tap

    # Single lane-dense matmul: full K*C_in contraction depth, lt*L_out lanes,
    # bf16 operands on the MXU with f32 accumulation.
    o_ref[...] = jnp.dot(
        w_ref[...], rhs_ref[...].astype(compute_dtype),
        preferred_element_type=jnp.float32).astype(o_ref.dtype)


def _pick_batch_tile(N, L_out):
    """Largest-possible lane density while keeping blocks legal.

    Prefer a batch-tile lt (divisor of N) whose lane width lt*L_out is a
    multiple of 128 (unmasked stores, several grid steps -> pipelining and
    megacore sharding); otherwise fall back to the whole batch in one block
    (block == full array is always legal)."""
    for lt in range(1, N):
        if N % lt == 0 and (lt * L_out) % 128 == 0 and lt * L_out <= 4096:
            return lt
    return N


def quaternion_conv1d(x, r_w, i_w, j_w, k_w, bias, stride, padding, dilatation,
                      compute_dtype=jnp.bfloat16):
    """x: (N, C_in, L); r/i/j/k weights: (C_out//4, C_in//4, K); bias: (C_out,)."""
    N, C_in, L = x.shape
    W = make_quaternion_kernel(r_w, i_w, j_w, k_w)            # (C_out, C_in, K)
    C_out, _, K = W.shape

    L_out = (L + 2 * padding - dilatation * (K - 1) - 1) // stride + 1
    L_pad = L + 2 * padding

    # Fold the taps into the contraction:  W2[co, k*C_in + ci] = W[co, ci, k]
    W2 = jnp.transpose(W, (0, 2, 1)).reshape(C_out, K * C_in).astype(compute_dtype)

    # Pad once; no im2col / cols tensor is ever materialised in HBM.
    x_pad = jnp.pad(x, ((0, 0), (0, 0), (padding, padding)))

    lt = _pick_batch_tile(N, L_out)
    grid = (N // lt,)

    kernel = functools.partial(
        qconv1d_kernel, K=K, C_in=C_in, L_out=L_out, stride=stride,
        dilatation=dilatation, lt=lt, compute_dtype=compute_dtype)

    # TODO(synk): for long sequences, additionally tile L_out (windowed x
    # blocks) and raise vmem_limit_bytes so the per-step footprint fits
    # v7x's 64 MiB VMEM.
    out_flat = pl.pallas_call(
        kernel,
        out_shape=jax.ShapeDtypeStruct((C_out, N * L_out), jnp.float32),
        grid_spec=pltpu.PrefetchScalarGridSpec(
            num_scalar_prefetch=0,
            grid=grid,
            in_specs=[
                # Weights: constant index_map -> loaded once, resident in VMEM.
                pl.BlockSpec((C_out, K * C_in), lambda t: (0, 0)),
                # Padded input rows for this batch tile.
                pl.BlockSpec((lt, C_in, L_pad), lambda t: (t, 0, 0)),
            ],
            # Lane-flattened output: batch folded into the lane dimension.
            out_specs=pl.BlockSpec((C_out, lt * L_out), lambda t: (0, t)),
            scratch_shapes=[pltpu.VMEM((K * C_in, lt * L_out), jnp.float32)],
        ),
        compiler_params=pltpu.CompilerParams(
            dimension_semantics=("parallel",)),
    )(W2, x_pad)

    # (C_out, N*L_out) -> (N, C_out, L_out); bias added as a lane-broadcast
    # in the wrapper (avoids a padded (C_out, 1) column block in the kernel).
    out = jnp.transpose(out_flat.reshape(C_out, N, L_out), (1, 0, 2))
    return out + bias[None, :, None].astype(out.dtype)


if __name__ == "__main__":
    # Module config: QuaternionConv(in_channels=8, out_channels=16,
    #                kernel_size=3, stride=1, padding=1, operation='convolution1d')
    in_channels, out_channels = 8, 16
    kernel_size, stride, padding, dilatation = 3, 1, 1, 1
    N, L = 2, 16

    # Deterministic parameter init (quaternion init, glorot criterion).
    rng = np.random.RandomState(42)
    w_shape = (out_channels // 4, in_channels // 4, kernel_size)
    r_np, i_np, j_np, k_np = quaternion_init(rng, w_shape, (kernel_size,))
    r_w, i_w, j_w, k_w = (jnp.asarray(a) for a in (r_np, i_np, j_np, k_np))
    bias = jnp.zeros((out_channels,), jnp.float32)  # reset_parameters() zeros bias

    # Deterministic input.
    x = jax.random.normal(jax.random.PRNGKey(0), (N, in_channels, L), jnp.float32)

    out = quaternion_conv1d(x, r_w, i_w, j_w, k_w, bias,
                            stride, padding, dilatation)
    out = jax.block_until_ready(out)

    # Reference check against lax conv (== F.conv1d semantics) using the same
    # bf16 operand rounding + f32 accumulation as the kernel.
    W_ref = make_quaternion_kernel(r_w, i_w, j_w, k_w)
    ref = lax.conv_general_dilated(
        x.astype(jnp.bfloat16), W_ref.astype(jnp.bfloat16),
        window_strides=(stride,), padding=[(padding, padding)],
        rhs_dilation=(dilatation,), dimension_numbers=("NCH", "OIH", "NCH"),
        preferred_element_type=jnp.float32,
    ) + bias[None, :, None]

    assert out.shape == ref.shape, (out.shape, ref.shape)
    np.testing.assert_allclose(np.asarray(out), np.asarray(ref),
                               rtol=2e-3, atol=2e-3)
    print("KERNEL_OK")
</pallas_src>

<mosaic_0001>
module attributes {stable_mosaic.version = 11 : i64} {
  func.func @qconv1d_kernel(%arg0: i32, %arg1: memref<16x24xbf16, #tpu.memory_space<vmem>>, %arg2: memref<2x8x18xf32, #tpu.memory_space<vmem>>, %arg3: memref<16x32xf32, #tpu.memory_space<vmem>>, %arg4: memref<24x32xf32, #tpu.memory_space<vmem>>) attributes {dimension_semantics = [#tpu.dimension_semantics<parallel>], iteration_bounds = array<i64: 1>, scalar_prefetch = 0 : i64, scratch_operands = 1 : i64, tpu.core_type = #tpu.core_type<tc>, window_params = [{pipeline_mode = #tpu.pipeline_mode<synchronous>, transform_indices = @transform_0, window_bounds = array<i64: 16, 24>}, {transform_indices = @transform_1, window_bounds = array<i64: 2, 8, 18>}, {transform_indices = @transform_2, window_bounds = array<i64: 16, 32>}]} {
    %c0 = arith.constant 0 : index
    %c0_0 = arith.constant 0 : index
    %c0_1 = arith.constant 0 : index
    %0 = vector.load %arg2[%c0, %c0_0, %c0_1] : memref<2x8x18xf32, #tpu.memory_space<vmem>>, vector<1x8x16xf32>
    %1 = vector.shape_cast %0 : vector<1x8x16xf32> to vector<8x16xf32>
    %c0_2 = arith.constant 0 : index
    %c0_3 = arith.constant 0 : index
    %2 = vector.load %arg4[%c0_2, %c0_3] : memref<24x32xf32, #tpu.memory_space<vmem>>, vector<8x16xf32>
    tpu.vector_store %arg4[%c0_2, %c0_3], %1 {strides = array<i32>} : memref<24x32xf32, #tpu.memory_space<vmem>>, vector<8x16xf32>,
    %c0_4 = arith.constant 0 : index
    %c0_5 = arith.constant 0 : index
    %c1 = arith.constant 1 : index
    %3 = vector.load %arg2[%c0_4, %c0_5, %c1] : memref<2x8x18xf32, #tpu.memory_space<vmem>>, vector<1x8x16xf32>
    %4 = vector.shape_cast %3 : vector<1x8x16xf32> to vector<8x16xf32>
    %c8 = arith.constant 8 : index
    %c0_6 = arith.constant 0 : index
    %5 = vector.load %arg4[%c8, %c0_6] : memref<24x32xf32, #tpu.memory_space<vmem>>, vector<8x16xf32>
    tpu.vector_store %arg4[%c8, %c0_6], %4 {strides = array<i32>} : memref<24x32xf32, #tpu.memory_space<vmem>>, vector<8x16xf32>,
    %c0_7 = arith.constant 0 : index
    %c0_8 = arith.constant 0 : index
    %c2 = arith.constant 2 : index
    %6 = vector.load %arg2[%c0_7, %c0_8, %c2] : memref<2x8x18xf32, #tpu.memory_space<vmem>>, vector<1x8x16xf32>
    %7 = vector.shape_cast %6 : vector<1x8x16xf32> to vector<8x16xf32>
    %c16 = arith.constant 16 : index
    %c0_9 = arith.constant 0 : index
    %8 = vector.load %arg4[%c16, %c0_9] : memref<24x32xf32, #tpu.memory_space<vmem>>, vector<8x16xf32>
    tpu.vector_store %arg4[%c16, %c0_9], %7 {strides = array<i32>} : memref<24x32xf32, #tpu.memory_space<vmem>>, vector<8x16xf32>,
    %c1_10 = arith.constant 1 : index
    %c0_11 = arith.constant 0 : index
    %c0_12 = arith.constant 0 : index
    %9 = vector.load %arg2[%c1_10, %c0_11, %c0_12] : memref<2x8x18xf32, #tpu.memory_space<vmem>>, vector<1x8x16xf32>
    %10 = vector.shape_cast %9 : vector<1x8x16xf32> to vector<8x16xf32>
    %c0_13 = arith.constant 0 : index
    %c16_14 = arith.constant 16 : index
    %11 = vector.load %arg4[%c0_13, %c16_14] : memref<24x32xf32, #tpu.memory_space<vmem>>, vector<8x16xf32>
    tpu.vector_store %arg4[%c0_13, %c16_14], %10 {strides = array<i32>} : memref<24x32xf32, #tpu.memory_space<vmem>>, vector<8x16xf32>,
    %c1_15 = arith.constant 1 : index
    %c0_16 = arith.constant 0 : index
    %c1_17 = arith.constant 1 : index
    %12 = vector.load %arg2[%c1_15, %c0_16, %c1_17] : memref<2x8x18xf32, #tpu.memory_space<vmem>>, vector<1x8x16xf32>
    %13 = vector.shape_cast %12 : vector<1x8x16xf32> to vector<8x16xf32>
    %c8_18 = arith.constant 8 : index
    %c16_19 = arith.constant 16 : index
    %14 = vector.load %arg4[%c8_18, %c16_19] : memref<24x32xf32, #tpu.memory_space<vmem>>, vector<8x16xf32>
    tpu.vector_store %arg4[%c8_18, %c16_19], %13 {strides = array<i32>} : memref<24x32xf32, #tpu.memory_space<vmem>>, vector<8x16xf32>,
    %c1_20 = arith.constant 1 : index
    %c0_21 = arith.constant 0 : index
    %c2_22 = arith.constant 2 : index
    %15 = vector.load %arg2[%c1_20, %c0_21, %c2_22] : memref<2x8x18xf32, #tpu.memory_space<vmem>>, vector<1x8x16xf32>
    %16 = vector.shape_cast %15 : vector<1x8x16xf32> to vector<8x16xf32>
    %c16_23 = arith.constant 16 : index
    %c16_24 = arith.constant 16 : index
    %17 = vector.load %arg4[%c16_23, %c16_24] : memref<24x32xf32, #tpu.memory_space<vmem>>, vector<8x16xf32>
    tpu.vector_store %arg4[%c16_23, %c16_24], %16 {strides = array<i32>} : memref<24x32xf32, #tpu.memory_space<vmem>>, vector<8x16xf32>,
    %c0_25 = arith.constant 0 : index
    %c0_26 = arith.constant 0 : index
    %18 = vector.load %arg1[%c0_25, %c0_26] : memref<16x24xbf16, #tpu.memory_space<vmem>>, vector<16x24xbf16>
    %c0_27 = arith.constant 0 : index
    %c0_28 = arith.constant 0 : index
    %19 = vector.load %arg4[%c0_27, %c0_28] : memref<24x32xf32, #tpu.memory_space<vmem>>, vector<24x32xf32>
    %20 = arith.truncf %19 : vector<24x32xf32> to vector<24x32xbf16>
    %cst = arith.constant dense<0.000000e+00> : vector<16x32xf32>
    %21 = tpu.matmul %18, %20, %cst {dimension_numbers = #tpu.dot_dimension_numbers<[1], [0], [0], [1], [0, 0, 1, 1], [], []>} : vector<16x24xbf16>, vector<24x32xbf16>, vector<16x32xf32> -> vector<16x32xf32>
    %c0_29 = arith.constant 0 : index
    %c0_30 = arith.constant 0 : index
    %22 = vector.load %arg3[%c0_29, %c0_30] : memref<16x32xf32, #tpu.memory_space<vmem>>, vector<16x32xf32>
    tpu.vector_store %arg3[%c0_29, %c0_30], %21 {strides = array<i32>} : memref<16x32xf32, #tpu.memory_space<vmem>>, vector<16x32xf32>,
    return
  }
  func.func @transform_0(%arg0: i32) -> (i32, i32) {
    %c0_i32 = arith.constant 0 : i32
    %c0_i32_0 = arith.constant 0 : i32
    %c0_i32_1 = arith.constant 0 : i32
    return %c0_i32, %c0_i32_0 : i32, i32
  }
  func.func @transform_1(%arg0: i32) -> (i32, i32, i32) {
    %c0_i32 = arith.constant 0 : i32
    %c0_i32_0 = arith.constant 0 : i32
    %c0_i32_1 = arith.constant 0 : i32
    return %arg0, %c0_i32, %c0_i32_0 : i32, i32, i32
  }
  func.func @transform_2(%arg0: i32) -> (i32, i32) {
    %c0_i32 = arith.constant 0 : i32
    %c0_i32_0 = arith.constant 0 : i32
    return %c0_i32, %arg0 : i32, i32
  }
}

</mosaic_0001>

<bundles_post_ra>
// kernel: tpu_custom_call.1
= control target key start
LH: loop header
LB: loop body
LE: loop exit
PB: predicated region body
PF: predicated region fallthrough
CT: control target
= control target key end

     0   :  { %7 = vsyncpa [#allocation4], 0  ;;  %s332_s0 = inlined_call_operand.hbm [shape: bf16[16,24], index: 0, kind: input, shape index: {}]   ;;  %s333_s1 = inlined_call_operand.hbm [shape: f32[2,8,18], index: 1, kind: input, shape index: {}]   ;;  %s334_s2 = inlined_call_operand.hbm [shape: f32[16,32], index: 2, kind: output, shape index: {}]  }
   0x1   :  { %8 = vsyncpa [#allocation7], 0 }
   0x2   :  { %9 = vsyncpa [#allocation5], 0  ;;  %s258_s9 = smov [#allocation3]   ;;  %s186_s13 = scalar_lea.hbm %s332_s0, 128 }
   0x3   :  { %s15_s10 = sshll.u32 %s258_s9, 4  ;;  %p187_p0 = scmp.ne.s32.totalorder %s332_s0, %s186_s13  ;;  %s16_s10 = int_to_ptr.vmem [resolvable:$true] %s15_s10 }
   0x4   :  { %p190_p1 = scmp.lt.u32.totalorder %s186_s13, %s332_s0 }
   0x6   :  { %p192_p2 = pnand %p190_p1, %p187_p0 }
   0x8   :  { %195 = shalt.err (!%p192_p2)
}
   0x9   :  { %s196_s18 = scalar_lea.vmem %s16_s10, 128  ;;  %p201_p4 = scmp.lt.s32.totalorder %s16_s10, %s16_s10 }
   0xa   :  { %p197_p3 = scmp.ne.s32.totalorder %s16_s10, %s196_s18  ;;  %p202_p5 = scmp.lt.s32.totalorder %s196_s18, %s196_s18 }
   0xc   :  { %p203_p6 = por %p202_p5, %p201_p4 }
   0xe   :  { %p204_p7 = pnand %p203_p6, %p197_p3 }
  0x10   :  { %207 = shalt.err (!%p204_p7)
}
  0x11   :  { %s259_s19 = smov 64   ;;  %s260_s20 = smov 4  }
  0x12   :  { %21 = dma.hbm_to_vmem [thread:$0]  %s332_s0, 128, %s16_s10, [#allocation4], %s259_s19, %s259_s19, %s260_s20  }
  0x13   :  { %s261_s23 = smov [#allocation6]   ;;  %s208_s27 = scalar_lea.hbm %s333_s1, 256 }
  0x14   :  { %s27_s24 = sshll.u32 %s261_s23, 4  ;;  %p209_p8 = scmp.ne.s32.totalorder %s333_s1, %s208_s27  ;;  %s28_s24 = int_to_ptr.vmem [resolvable:$true] %s27_s24 }
  0x15   :  { %p212_p9 = scmp.lt.u32.totalorder %s208_s27, %s333_s1 }
  0x17   :  { %p214_p10 = pnand %p212_p9, %p209_p8 }
  0x19   :  { %217 = shalt.err (!%p214_p10)
}
  0x1a   :  { %s218_s4 = scalar_lea.vmem %s28_s24, 256  ;;  %p223_p12 = scmp.lt.s32.totalorder %s28_s24, %s28_s24 }
  0x1b   :  { %p219_p11 = scmp.ne.s32.totalorder %s28_s24, %s218_s4  ;;  %p224_p13 = scmp.lt.s32.totalorder %s218_s4, %s218_s4 }
  0x1d   :  { %p225_p0 = por %p224_p13, %p223_p12 }
  0x1f   :  { %p226_p1 = pnand %p225_p0, %p219_p11 }
  0x21   :  { %229 = shalt.err (!%p226_p1)
}
  0x22   :  { %s262_s0 = smov 128   ;;  %s263_s5 = smov 8  }
  0x23   :  { %33 = dma.hbm_to_vmem [thread:$0]  %s333_s1, 256, %s28_s24, [#allocation7], %s262_s0, %s262_s0, %s263_s5  }
  0x24   :  { %252 = dma.done.wait [#allocation4], 128  }
  0x25   :  { %253 = vsyncadd [#allocation4], 4294967168 }
  0x26   :  { %254 = dma.done.wait [#allocation7], 256  }
  0x27   :  { %255 = vsyncadd [#allocation7], 4294967040  ;;  %v264_v0 = vmov 0.0   ;;  %v44_v1 = vld [vmem:[#allocation6] sm:$0xff]  ;;  %v64_v2 = vld [vmem:[#allocation6 + $0x8] sm:$0xff]  ;;  %vm42_vm0 = vcmask 130048  }
  0x28   :  { %163 = vmatprep.subr.bf16.mxu0 %v264_v0  ;;  %s265_s8 = smov 127   ;;  %s266_s9 = smov 15   ;;  %43 = vst.msk [vmem:[#allocation2] sm:$0xff] %vm42_vm0, %v44_v1  ;;  %vm269_vm1 = vmmov 0   ;;  %vm62_vm2 = vcmask 261248   ;;  %vm92_vm3 = vcmask 1043456  }
  0x29   :  { %46 = vrot.lane.b32.xlu0 %v44_v1, %s265_s8  ;;  %66 = vrot.lane.b32.xlu1 %v64_v2, %s266_s9  ;;  %s267_s10 = smov 16   ;;  %s268_s11 = smov 126   ;;  %v185_v14 = vld [vmem:[#allocation3] sm:$0xff]   ;;  %vm88_vm4 = vcmask 195584   ;;  %vm137_vm5 = vcmask 261120  }
  0x2a   :  { %167 = vmatprep.mubr.msk.bf16.mxu0 %vm269_vm1, %v264_v0  ;;  %s270_s1 = smov 14   ;;  %s271_s12 = smov [#allocation8]  }
  0x2b   :  { %s145_s13 = sshll.u32 %s271_s12, 4  ;;  %s146_s13 = int_to_ptr.vmem [resolvable:$true] %s145_s13 }
  0x2c   :  { %s230_s14 = scalar_lea.vmem %s146_s13, 256  ;;  %p235_p3 = scmp.lt.s32.totalorder %s146_s13, %s146_s13 }
  0x2d   :  { %59 = vrot.lane.b32.xlu0 %v64_v2, %s267_s10  ;;  %52 = vrot.lane.b32.xlu1 %v44_v1, %s268_s11  ;;  %p231_p2 = scmp.ne.s32.totalorder %s146_s13, %s230_s14  ;;  %p236_p4 = scmp.lt.s32.totalorder %s230_s14, %s230_s14 }
  0x2f   :  { %p237_p5 = por %p236_p4, %p235_p3 }
  0x31   :  { %72 = vrot.lane.b32.xlu0 %v64_v2, %s270_s1  ;;  %p238_p6 = pnand %p237_p5, %p231_p2 }
  0x9b   :  { %v47_v3 = vpop.permute.xlu0 %46  ;;  %v67_v4 = vpop.permute.xlu1 %66 }
  0x9c   :  { %49 = vst.msk [vmem:[#allocation2 + $0x8] sm:$0xff] %vm42_vm0, %v47_v3 }
  0x9d   :  { %69 = vst.msk [vmem:[#allocation2 + $0x8] sm:$0xff] %vm62_vm2, %v67_v4 }
  0x9f   :  { %v60_v5 = vpop.permute.xlu0 %59  ;;  %v53_v6 = vpop.permute.xlu1 %52 }
  0xa0   :  { %63 = vst.msk [vmem:[#allocation2] sm:$0xff] %vm62_vm2, %v60_v5 }
  0xa1   :  { %55 = vst.msk [vmem:[#allocation2 + $0x10] sm:$0xff] %vm42_vm0, %v53_v6 }
  0xa3   :  { %v73_v7 = vpop.permute.xlu0 %72 }
  0xa4   :  { %75 = vst.msk [vmem:[#allocation2 + $0x10] sm:$0xff] %vm62_vm2, %v73_v7  ;;  %v79_v8 = vld [vmem:[#allocation2 + $0x8] sm:$0xff] }
  0xa7   :  { %v78_v9 = vld [vmem:[#allocation2] sm:$0xff] }
  0xa8   :  { %v81_v10 = vpack.c.bf16 %v79_v8, %v78_v9 }
  0xaa   :  { %164 = vmatpush3.bf16.msra.mxu0 %v81_v10 }
  0xab   :  { %165 = vmatprep.subr.bf16.mxu0 %v264_v0  ;;  %v80_v11 = vld [vmem:[#allocation2 + $0x10] sm:$0xff] }
  0xac   :  { %v82_v12 = vpack.c.bf16 %v80_v11, %v80_v11 }
  0xae   :  { %v94_v13 = vsel %vm92_vm3, %v82_v12, 0 }
  0xaf   :  { %166 = vmatpush3.bf16.msra.mxu0 %v94_v13 }
  0xb2   :  { %168 = vmatmul.mubr.msk.bf16.vlgmr.msra.gmra.mrb[0].mxu0 %vm88_vm4, %v185_v14 }
 0x185   :  { %v130_v15 = vpop.f32.mrb[0].mxu0 }
 0x186   :  { %138 = vst.msk [vmem:[#allocation8] sm:$0xff] %vm137_vm5, %v130_v15  ;;  %v169_v16 = vpop.f32.mrb[1].mxu0 }
 0x187   :  { %v133_v17 = vpop.f32.mrb[2].mxu0 }
 0x188   :  { %139 = vst.msk [vmem:[#allocation8 + $0x8] sm:$0xff] %vm137_vm5, %v133_v17  ;;  %v170_v18 = vpop.f32.mrb[3].mxu0 }
 0x189   :  { %241 = shalt.err (!%p238_p6)
}
 0x18a   :  { %s242_s17 = scalar_lea.hbm %s334_s2, 256 }
 0x18b   :  { %p243_p7 = scmp.ne.s32.totalorder %s334_s2, %s242_s17  ;;  %p246_p8 = scmp.lt.u32.totalorder %s242_s17, %s334_s2 }
 0x18d   :  { %p248_p9 = pnand %p246_p8, %p243_p7 }
 0x18f   :  { %251 = shalt.err (!%p248_p9)
}
 0x190   :  { %151 = dma.vmem_to_hbm [thread:$0]  %s146_s13, 256, %s334_s2, [#allocation5], %s262_s0, %s262_s0, %s263_s5  }
 0x191   :  { %256 = dma.done.wait [#allocation5], 256  }
 0x192   :  { %257 = vsyncadd [#allocation5], 4294967040 }
 0x193   :  { %155 = vsyncpa [#allocation4], 1 }
 0x194   :  { %156 = vsyncpa [#allocation7], 1 }
 0x195   :  { %157 = vsyncpa [#allocation5], 1 }

</bundles_post_ra>
